<compile_context>
chip_gen: v5e
topology: v5e:2x2
jax: 0.10.0
libtpu: 0.0.40
codegen_flags: <defaults>
</compile_context>

<pallas_src>
import functools

import jax
import jax.numpy as jnp
from jax.experimental import pallas as pl
from jax.experimental.pallas import tpu as pltpu

NEG_SLOPE = 0.01  # nn.LeakyReLU() default
LANE = 128


def _leaky_relu(x):
    return jnp.where(x > 0, x, NEG_SLOPE * x)


def _round_up(n, m):
    return ((n + m - 1) // m) * m


def qnet_kernel(slab_ref, xT_ref, oT_ref, *, in_size, hidden, out_size):
    """Fused fc1 -> LeakyReLU -> fc_out -> LeakyReLU on one batch block.

    slab_ref: [rows, 128] packed params (see pack_params).
    xT_ref:   [in_size, BN]   (batch on the lane axis -> lane-dense loads).
    oT_ref:   [out_size, BN]  (lane-dense stores).
    """
    # Static slices of the packed parameter slab.
    w1 = slab_ref[0:hidden, 0:in_size]                            # [hid, in]
    b1 = slab_ref[0:hidden, in_size:in_size + 1]                  # [hid, 1]
    w2 = slab_ref[hidden:hidden + out_size, 0:hidden]             # [out, hid]
    b2 = slab_ref[hidden:hidden + out_size, hidden:hidden + 1]    # [out, 1]

    xT = xT_ref[...]                                              # [in, BN]

    # fc1 + LeakyReLU (MXU matmul, f32 accumulate; bias broadcasts over lanes)
    h = jnp.dot(w1, xT, preferred_element_type=jnp.float32) + b1  # [hid, BN]
    h = _leaky_relu(h)

    # fc_out + LeakyReLU
    o = jnp.dot(w2, h, preferred_element_type=jnp.float32) + b2   # [out, BN]
    oT_ref[...] = _leaky_relu(o).astype(oT_ref.dtype)


def pack_params(w1, b1, w2, b2):
    """Pack PyTorch-layout params into one lane-aligned f32 slab [rows, 128].

    Layout:
      rows [0, hidden)           lanes [0, in_size)  : w1   (fc1.weight)
      rows [0, hidden)           lane  in_size       : b1   (fc1.bias, column)
      rows [hidden, hidden+out)  lanes [0, hidden)   : w2   (fc_out.weight)
      rows [hidden, hidden+out)  lane  hidden        : b2   (fc_out.bias, column)
    """
    hidden, in_size = w1.shape
    out_size = w2.shape[0]
    rows = hidden + _round_up(out_size, 8)
    slab = jnp.zeros((rows, LANE), jnp.float32)
    slab = slab.at[:hidden, :in_size].set(w1.astype(jnp.float32))
    slab = slab.at[:hidden, in_size].set(b1.astype(jnp.float32))
    slab = slab.at[hidden:hidden + out_size, :hidden].set(w2.astype(jnp.float32))
    slab = slab.at[hidden:hidden + out_size, hidden].set(b2.astype(jnp.float32))
    return slab


def qnet_forward(x, w1, b1, w2, b2, *, block_b=1024):
    """QNet forward.

    x:  [B, in_size]           (batch-major, as the PyTorch module receives it)
    w1: [hidden, in_size]      (fc1.weight, PyTorch layout)
    b1: [hidden]               (fc1.bias)
    w2: [out_size, hidden]     (fc_out.weight, PyTorch layout)
    b2: [out_size]             (fc_out.bias)
    returns [B, out_size] f32.
    """
    B, in_size = x.shape
    hidden = w1.shape[0]
    out_size = w2.shape[0]

    slab = pack_params(w1, b1, w2, b2)
    rows = slab.shape[0]

    # Batch on the lane axis, padded to a 128-lane-aligned block size.
    bn = min(_round_up(block_b, LANE), _round_up(max(B, 1), LANE))
    b_pad = _round_up(B, bn)
    xT = jnp.zeros((in_size, b_pad), jnp.float32).at[:, :B].set(
        x.astype(jnp.float32).T)

    kernel = functools.partial(
        qnet_kernel, in_size=in_size, hidden=hidden, out_size=out_size)

    oT = pl.pallas_call(
        kernel,
        out_shape=jax.ShapeDtypeStruct((out_size, b_pad), jnp.float32),
        grid=(b_pad // bn,),
        in_specs=[
            pl.BlockSpec((rows, LANE), lambda j: (0, 0)),   # params: resident
            pl.BlockSpec((in_size, bn), lambda j: (0, j)),  # x block (lane-dense)
        ],
        out_specs=pl.BlockSpec((out_size, bn), lambda j: (0, j)),
        compiler_params=pltpu.CompilerParams(
            dimension_semantics=("parallel",)),  # megacore sharding on v7x
    )(slab, xT)

    return oT.T[:B, :]


def init_params(key, in_size, hidden, out_size):
    """Deterministic synthetic init (PyTorch nn.Linear uniform bounds, PyTorch layout)."""
    k1, k2, k3, k4 = jax.random.split(key, 4)
    bound1 = 1.0 / jnp.sqrt(in_size)
    bound2 = 1.0 / jnp.sqrt(hidden)
    w1 = jax.random.uniform(k1, (hidden, in_size), jnp.float32, -bound1, bound1)
    b1 = jax.random.uniform(k2, (hidden,), jnp.float32, -bound1, bound1)
    w2 = jax.random.uniform(k3, (out_size, hidden), jnp.float32, -bound2, bound2)
    b2 = jax.random.uniform(k4, (out_size,), jnp.float32, -bound2, bound2)
    return w1, b1, w2, b2


def qnet_reference(x, w1, b1, w2, b2):
    h = _leaky_relu(x @ w1.T + b1)
    return _leaky_relu(h @ w2.T + b2)


if __name__ == "__main__":
    # CartPole-like sizes: state dim 4, hidden 16, 2 actions.
    IN_SIZE, HIDDEN, OUT_SIZE = 4, 16, 2

    key = jax.random.PRNGKey(0)
    kx_small, kx_big, kp = jax.random.split(key, 3)
    w1, b1, w2, b2 = init_params(kp, IN_SIZE, HIDDEN, OUT_SIZE)

    # Small batch (single RL step).
    x_small = jax.random.normal(kx_small, (8, IN_SIZE), jnp.float32)
    out_small = jax.block_until_ready(qnet_forward(x_small, w1, b1, w2, b2))
    ref_small = qnet_reference(x_small, w1, b1, w2, b2)
    assert out_small.shape == (8, OUT_SIZE)
    assert jnp.allclose(out_small, ref_small, atol=1e-5, rtol=1e-5), \
        "small-batch mismatch vs reference"

    # Larger batch: exercises the parallel batch grid (multiple blocks + padding).
    x_big = jax.random.normal(kx_big, (1000, IN_SIZE), jnp.float32)
    out_big = jax.block_until_ready(
        qnet_forward(x_big, w1, b1, w2, b2, block_b=256))
    ref_big = qnet_reference(x_big, w1, b1, w2, b2)
    assert out_big.shape == (1000, OUT_SIZE)
    assert jnp.allclose(out_big, ref_big, atol=1e-5, rtol=1e-5), \
        "large-batch mismatch vs reference"

    print("KERNEL_OK")
</pallas_src>

<mosaic_0001>
module attributes {stable_mosaic.version = 11 : i64} {
  func.func @qnet_kernel(%arg0: i32, %arg1: memref<24x128xf32, #tpu.memory_space<vmem>>, %arg2: memref<4x128xf32, #tpu.memory_space<vmem>>, %arg3: memref<2x128xf32, #tpu.memory_space<vmem>>) attributes {dimension_semantics = [#tpu.dimension_semantics<parallel>], iteration_bounds = array<i64: 1>, scalar_prefetch = 0 : i64, scratch_operands = 0 : i64, tpu.core_type = #tpu.core_type<tc>, window_params = [{pipeline_mode = #tpu.pipeline_mode<synchronous>, transform_indices = @transform_0, window_bounds = array<i64: 24, 128>}, {transform_indices = @transform_1, window_bounds = array<i64: 4, 128>}, {transform_indices = @transform_2, window_bounds = array<i64: 2, 128>}]} {
    %c0 = arith.constant 0 : index
    %c0_0 = arith.constant 0 : index
    %0 = vector.load %arg1[%c0, %c0_0] : memref<24x128xf32, #tpu.memory_space<vmem>>, vector<16x4xf32>
    %c0_1 = arith.constant 0 : index
    %c4 = arith.constant 4 : index
    %1 = vector.load %arg1[%c0_1, %c4] : memref<24x128xf32, #tpu.memory_space<vmem>>, vector<16x1xf32>
    %c16 = arith.constant 16 : index
    %c0_2 = arith.constant 0 : index
    %2 = vector.load %arg1[%c16, %c0_2] : memref<24x128xf32, #tpu.memory_space<vmem>>, vector<2x16xf32>
    %c16_3 = arith.constant 16 : index
    %c16_4 = arith.constant 16 : index
    %3 = vector.load %arg1[%c16_3, %c16_4] : memref<24x128xf32, #tpu.memory_space<vmem>>, vector<2x1xf32>
    %c0_5 = arith.constant 0 : index
    %c0_6 = arith.constant 0 : index
    %4 = vector.load %arg2[%c0_5, %c0_6] : memref<4x128xf32, #tpu.memory_space<vmem>>, vector<4x128xf32>
    %cst = arith.constant dense<0.000000e+00> : vector<16x128xf32>
    %5 = tpu.matmul %0, %4, %cst {dimension_numbers = #tpu.dot_dimension_numbers<[1], [0], [0], [1], [0, 0, 1, 1], [], []>} : vector<16x4xf32>, vector<4x128xf32>, vector<16x128xf32> -> vector<16x128xf32>
    %6 = vector.broadcast %1 : vector<16x1xf32> to vector<16x128xf32>
    %7 = arith.addf %5, %6 : vector<16x128xf32>
    %cst_7 = arith.constant 0.000000e+00 : f32
    %8 = vector.broadcast %cst_7 : f32 to vector<16x128xf32>
    %9 = arith.cmpf ogt, %7, %8 : vector<16x128xf32>
    %cst_8 = arith.constant 0.00999999977 : f32
    %10 = vector.broadcast %cst_8 : f32 to vector<16x128xf32>
    %11 = arith.mulf %10, %7 : vector<16x128xf32>
    %12 = arith.select %9, %7, %11 : vector<16x128xi1>, vector<16x128xf32>
    %cst_9 = arith.constant dense<0.000000e+00> : vector<2x128xf32>
    %13 = tpu.matmul %2, %12, %cst_9 {dimension_numbers = #tpu.dot_dimension_numbers<[1], [0], [0], [1], [0, 0, 1, 1], [], []>} : vector<2x16xf32>, vector<16x128xf32>, vector<2x128xf32> -> vector<2x128xf32>
    %14 = vector.broadcast %3 : vector<2x1xf32> to vector<2x128xf32>
    %15 = arith.addf %13, %14 : vector<2x128xf32>
    %cst_10 = arith.constant 0.000000e+00 : f32
    %16 = vector.broadcast %cst_10 : f32 to vector<2x128xf32>
    %17 = arith.cmpf ogt, %15, %16 : vector<2x128xf32>
    %cst_11 = arith.constant 0.00999999977 : f32
    %18 = vector.broadcast %cst_11 : f32 to vector<2x128xf32>
    %19 = arith.mulf %18, %15 : vector<2x128xf32>
    %20 = arith.select %17, %15, %19 : vector<2x128xi1>, vector<2x128xf32>
    %c0_12 = arith.constant 0 : index
    %c0_13 = arith.constant 0 : index
    %21 = vector.load %arg3[%c0_12, %c0_13] : memref<2x128xf32, #tpu.memory_space<vmem>>, vector<2x128xf32>
    tpu.vector_store %arg3[%c0_12, %c0_13], %20 {strides = array<i32>} : memref<2x128xf32, #tpu.memory_space<vmem>>, vector<2x128xf32>,
    return
  }
  func.func @transform_0(%arg0: i32) -> (i32, i32) {
    %c0_i32 = arith.constant 0 : i32
    %c0_i32_0 = arith.constant 0 : i32
    %c0_i32_1 = arith.constant 0 : i32
    return %c0_i32, %c0_i32_0 : i32, i32
  }
  func.func @transform_1(%arg0: i32) -> (i32, i32) {
    %c0_i32 = arith.constant 0 : i32
    %c0_i32_0 = arith.constant 0 : i32
    return %c0_i32, %arg0 : i32, i32
  }
  func.func @transform_2(%arg0: i32) -> (i32, i32) {
    %c0_i32 = arith.constant 0 : i32
    %c0_i32_0 = arith.constant 0 : i32
    return %c0_i32, %arg0 : i32, i32
  }
}

</mosaic_0001>

<bundles_post_ra>
// kernel: tpu_custom_call.1
= control target key start
LH: loop header
LB: loop body
LE: loop exit
PB: predicated region body
PF: predicated region fallthrough
CT: control target
= control target key end

     0   :  { %7 = vsyncpa [#allocation3], 0  ;;  %s268_s0 = inlined_call_operand.hbm [shape: f32[24,128], index: 0, kind: input, shape index: {}]   ;;  %s269_s1 = inlined_call_operand.hbm [shape: f32[4,128], index: 1, kind: input, shape index: {}]   ;;  %s270_s2 = inlined_call_operand.hbm [shape: f32[2,128], index: 2, kind: output, shape index: {}]  }
   0x1   :  { %8 = vsyncpa [#allocation6], 0 }
   0x2   :  { %9 = vsyncpa [#allocation4], 0  ;;  %s14_s11 = sshll.u32 %s268_s0, 4  ;;  %s237_s12 = smov [#allocation2]   ;;  %s15_s11 = int_to_ptr.hbm [resolvable:$true] %s14_s11 }
   0x3   :  { %s16_s13 = sshll.u32 %s237_s12, 4  ;;  %s28_s16 = sshll.u32 %s269_s1, 4  ;;  %s17_s13 = int_to_ptr.vmem [resolvable:$true] %s16_s13  ;;  %s29_s16 = int_to_ptr.hbm [resolvable:$true] %s28_s16 }
   0x4   :  { %s238_s17 = smov 128   ;;  %s239_s18 = smov 8  }
   0x5   :  { %22 = dma.hbm_to_vmem [thread:$0]  %s15_s11, 384, %s17_s13, [#allocation3], %s238_s17, %s238_s17, %s239_s18  }
   0x6   :  { %s240_s19 = smov [#allocation5]  }
   0x7   :  { %s30_s20 = sshll.u32 %s240_s19, 4  ;;  %s31_s20 = int_to_ptr.vmem [resolvable:$true] %s30_s20 }
   0x8   :  { %33 = dma.hbm_to_vmem [thread:$0]  %s29_s16, 64, %s31_s20, [#allocation6]  }
   0x9   :  { %231 = dma.done.wait [#allocation3], 384  }
   0xa   :  { %232 = vsyncadd [#allocation3], 4294966912 }
   0xb   :  { %233 = dma.done.wait [#allocation6], 64  }
   0xc   :  { %234 = vsyncadd [#allocation6], 4294967232  ;;  %v241_v0 = vmov 4   ;;  %vm61_vm0 = vcmask 1043456   ;;  %vm56_vm1 = vcmask 31744   ;;  %v42_v2 = vld [vmem:[#allocation2] sm:$0xff] }
   0xd   :  { %156 = vset.pattern.permute.xlu0 %v241_v0  ;;  %v45_v1 = vld [vmem:[#allocation5] sm:$0xf]  ;;  %v43_v3 = vld [vmem:[#allocation2 + $0x8] sm:$0xff]  ;;  %v44_v4 = vld [vmem:[#allocation2 + $0x10] sm:$0x3]  ;;  %v242_v5 = vmov 16  }
   0xe   :  { %144 = vmatpush.msk.msra.mxu0 %vm61_vm0, %v45_v1  ;;  %148 = vmatpush.msk.msra.mxu2 %vm61_vm0, %v45_v1  ;;  %vm99_vm4 = vcmask 130048   ;;  %s243_s0 = smov [#allocation7]   ;;  %s133_s23 = sshll.u32 %s270_s2, 4  ;;  %s134_s23 = int_to_ptr.hbm [resolvable:$true] %s133_s23 }
   0xf   :  { %145 = vmatmul.msk.f32.vlgmr.msra.gmra.mxu0 %vm56_vm1, %v42_v2  ;;  %146 = vmatmul.msk.f32.vlgmr.msra.gmra.mxu2 %vm56_vm1, %v43_v3  ;;  %s131_s1 = sshll.u32 %s243_s0, 4  ;;  %s132_s1 = int_to_ptr.vmem [resolvable:$true] %s131_s1 }
  0x10   :  { %53 = vperm.xlu0 %156, %v43_v3   ;;  %157 = vset.pattern.permute.xlu1 %v242_v5 }
  0x11   :  { %96 = vperm.xlu1 %157, %v44_v4  }
  0x18   :  { %48 = vperm.xlu0 %156, %v42_v2  }
  0x20   :  { %158 = vset.pattern.permute.xlu0 %v242_v5 }
  0x82   :  { %v54_v6 = vpop.permute.xlu0 %53 }
  0x83   :  { %v97_v16 = vpop.permute.xlu1 %96 }
  0x8a   :  { %v49_v7 = vpop.permute.xlu0 %48 }
  0x8c   :  { %v82_v8 = vpop.f32.mrf.mxu0 }
  0x8d   :  { %v83_v9 = vadd.f32 %v82_v8, %v49_v7 }
  0x8f   :  { %v90_v13 = vmul.f32 0.01, %v83_v9  ;;  %vm88_vm3 = vcmp.gt.f32.partialorder %v83_v9, 0.0 }
  0x91   :  { %v92_v15 = vsel %vm88_vm3, %v83_v9, %v90_v13 }
  0x92   :  { %v85_v10 = vpop.f32.mrf.mxu2 }
  0x93   :  { %v86_v11 = vadd.f32 %v85_v10, %v54_v6 }
  0x95   :  { %vm89_vm2 = vcmp.gt.f32.partialorder %v86_v11, 0.0  ;;  %v91_v12 = vmul.f32 0.01, %v86_v11 }
  0x97   :  { %v93_v14 = vsel %vm89_vm2, %v86_v11, %v91_v12 }
  0x98   :  { %116 = vmatpush.msra.mxu1 %v93_v14 }
  0x9a   :  { %117 = vmatpush.msra.mxu1 %v92_v15 }
  0x9b   :  { %147 = vmatmul.msk.f32.vlgmr.msra.gmra.mxu1 %vm99_vm4, %v44_v4 }
 0x118   :  { %v119_v17 = vpop.f32.mrf.mxu1 }
 0x119   :  { %v120_v18 = vadd.f32 %v119_v17, %v97_v16 }
 0x11b   :  { %vm122_vm5 = vcmp.gt.f32.partialorder %v120_v18, 0.0  ;;  %v123_v19 = vmul.f32 0.01, %v120_v18 }
 0x11d   :  { %v124_v20 = vsel %vm122_vm5, %v120_v18, %v123_v19 }
 0x11e   :  { %125 = vst [vmem:[#allocation7] sm:$0x3] %v124_v20 }
 0x11f   :  { %136 = dma.vmem_to_hbm [thread:$0]  %s132_s1, 32, %s134_s23, [#allocation4]  }
 0x120   :  { %235 = dma.done.wait [#allocation4], 32  }
 0x121   :  { %236 = vsyncadd [#allocation4], 4294967264 }
 0x122   :  { %141 = vsyncpa [#allocation3], 1 }
 0x123   :  { %142 = vsyncpa [#allocation6], 1 }
 0x124   :  { %143 = vsyncpa [#allocation4], 1 }

</bundles_post_ra>
